<compile_context>
chip_gen: v7x
topology: tpu7x:2x2x1
jax: 0.10.0
libtpu: 0.0.40
codegen_flags: <defaults>
</compile_context>

<pallas_src>
import jax
import jax.numpy as jnp
from jax.experimental import pallas as pl
from jax.experimental.pallas import tpu as pltpu

LANE = 128


def _round_up(x, m):
    return ((x + m - 1) // m) * m


def dqn_kernel(x_ref, w1_ref, w2_ref, o_ref):
    # fc1 (no bias) -> tanh -> fc2 (no bias), one lane-dense VMEM block per grid step.
    x = x_ref[...]
    h = jnp.tanh(jnp.dot(x, w1_ref[...], preferred_element_type=jnp.float32))
    o_ref[...] = jnp.dot(h, w2_ref[...],
                         preferred_element_type=jnp.float32).astype(o_ref.dtype)


def dqn_forward(x, w1_t, w2_t, *, tb=512):
    """Forward pass of the DQN module.

    x:    [B, input_dim]    float32
    w1_t: [input_dim, hidden]  (PyTorch weight transposed to [in, out])
    w2_t: [hidden, output_dim]
    Returns [B, output_dim] float32.
    """
    B, in_dim = x.shape
    hidden = w1_t.shape[1]
    out_dim = w2_t.shape[1]

    # Pad every feature dim to the 128-lane vreg width (lane-dense loads/stores, full MXU tiles).
    in_p = _round_up(max(in_dim, 1), LANE)
    hid_p = _round_up(max(hidden, 1), LANE)
    out_p = _round_up(max(out_dim, 1), LANE)

    # Batch tile: big tiles for training-sized batches, but never larger than the
    # (sublane-aligned) batch itself for tiny inference calls.
    tb_eff = min(tb, _round_up(B, 8))
    b_pad = _round_up(B, tb_eff)

    x_p = jnp.zeros((b_pad, in_p), jnp.float32).at[:B, :in_dim].set(x.astype(jnp.float32))
    w1_p = jnp.zeros((in_p, hid_p), jnp.float32).at[:in_dim, :hidden].set(w1_t.astype(jnp.float32))
    w2_p = jnp.zeros((hid_p, out_p), jnp.float32).at[:hidden, :out_dim].set(w2_t.astype(jnp.float32))

    out_padded = pl.pallas_call(
        dqn_kernel,
        out_shape=jax.ShapeDtypeStruct((b_pad, out_p), jnp.float32),
        grid_spec=pltpu.PrefetchScalarGridSpec(
            num_scalar_prefetch=0,
            grid=(b_pad // tb_eff,),
            in_specs=[
                # Activations: one (TB, 128) tile per grid step, pipelined HBM<->VMEM.
                pl.BlockSpec((tb_eff, in_p), lambda i: (i, 0)),
                # Weights: constant index_map -> DMA'd once, resident across grid steps.
                pl.BlockSpec((in_p, hid_p), lambda i: (0, 0)),
                pl.BlockSpec((hid_p, out_p), lambda i: (0, 0)),
            ],
            out_specs=pl.BlockSpec((tb_eff, out_p), lambda i: (i, 0)),
        ),
        compiler_params=pltpu.CompilerParams(
            # Batch tiles are independent -> shard across v7x's 2 TensorCores.
            dimension_semantics=("parallel",),
        ),
    )(x_p, w1_p, w2_p)

    # Strip the zero padding (rows and lanes) back to the logical output.
    return out_padded[:B, :out_dim]


def init_params(key, input_dim, hidden_dim, output_dim):
    """nn.Linear default init U(-1/sqrt(fan_in), 1/sqrt(fan_in)); stored as [in, out]."""
    k1, k2 = jax.random.split(key)
    b1 = 1.0 / jnp.sqrt(jnp.float32(input_dim))
    b2 = 1.0 / jnp.sqrt(jnp.float32(hidden_dim))
    w1_t = jax.random.uniform(k1, (input_dim, hidden_dim), jnp.float32, -b1, b1)
    w2_t = jax.random.uniform(k2, (hidden_dim, output_dim), jnp.float32, -b2, b2)
    return w1_t, w2_t


if __name__ == "__main__":
    key = jax.random.PRNGKey(0)
    kx, kp = jax.random.split(key)

    batch = 8
    input_dim = 4      # CartPole observation size
    hidden_dim = 32
    output_dim = 2     # CartPole action count

    x = jax.random.normal(kx, (batch, input_dim), jnp.float32)
    w1_t, w2_t = init_params(kp, input_dim, hidden_dim, output_dim)

    out = dqn_forward(x, w1_t, w2_t)
    out = jax.block_until_ready(out)

    # Reference: same math as the PyTorch module (both Linears bias=False, Tanh between).
    ref = jnp.tanh(x @ w1_t) @ w2_t
    assert out.shape == (batch, output_dim)
    assert jnp.allclose(out, ref, atol=1e-5, rtol=1e-5)

    # Also sanity-check a training-sized batch to exercise the batch grid + resident weights.
    xb = jax.random.normal(jax.random.PRNGKey(1), (1000, input_dim), jnp.float32)
    outb = jax.block_until_ready(dqn_forward(xb, w1_t, w2_t))
    refb = jnp.tanh(xb @ w1_t) @ w2_t
    assert outb.shape == (1000, output_dim)
    assert jnp.allclose(outb, refb, atol=1e-5, rtol=1e-5)

    print("KERNEL_OK")
</pallas_src>

<mosaic_0001>
module attributes {stable_mosaic.version = 11 : i64} {
  func.func @dqn_kernel(%arg0: i32, %arg1: memref<8x128xf32, #tpu.memory_space<vmem>>, %arg2: memref<128x128xf32, #tpu.memory_space<vmem>>, %arg3: memref<128x128xf32, #tpu.memory_space<vmem>>, %arg4: memref<8x128xf32, #tpu.memory_space<vmem>>) attributes {dimension_semantics = [#tpu.dimension_semantics<parallel>], iteration_bounds = array<i64: 1>, scalar_prefetch = 0 : i64, scratch_operands = 0 : i64, tpu.core_type = #tpu.core_type<tc>, window_params = [{transform_indices = @transform_0, window_bounds = array<i64: 8, 128>}, {pipeline_mode = #tpu.pipeline_mode<synchronous>, transform_indices = @transform_1, window_bounds = array<i64: 128, 128>}, {pipeline_mode = #tpu.pipeline_mode<synchronous>, transform_indices = @transform_2, window_bounds = array<i64: 128, 128>}, {transform_indices = @transform_3, window_bounds = array<i64: 8, 128>}]} {
    %c0 = arith.constant 0 : index
    %c0_0 = arith.constant 0 : index
    %0 = vector.load %arg1[%c0, %c0_0] : memref<8x128xf32, #tpu.memory_space<vmem>>, vector<8x128xf32>
    %c0_1 = arith.constant 0 : index
    %c0_2 = arith.constant 0 : index
    %1 = vector.load %arg2[%c0_1, %c0_2] : memref<128x128xf32, #tpu.memory_space<vmem>>, vector<128x128xf32>
    %cst = arith.constant dense<0.000000e+00> : vector<8x128xf32>
    %2 = tpu.matmul %0, %1, %cst {dimension_numbers = #tpu.dot_dimension_numbers<[1], [0], [0], [1], [0, 0, 1, 1], [], []>} : vector<8x128xf32>, vector<128x128xf32>, vector<8x128xf32> -> vector<8x128xf32>
    %3 = math.tanh %2 : vector<8x128xf32>
    %c0_3 = arith.constant 0 : index
    %c0_4 = arith.constant 0 : index
    %4 = vector.load %arg3[%c0_3, %c0_4] : memref<128x128xf32, #tpu.memory_space<vmem>>, vector<128x128xf32>
    %cst_5 = arith.constant dense<0.000000e+00> : vector<8x128xf32>
    %5 = tpu.matmul %3, %4, %cst_5 {dimension_numbers = #tpu.dot_dimension_numbers<[1], [0], [0], [1], [0, 0, 1, 1], [], []>} : vector<8x128xf32>, vector<128x128xf32>, vector<8x128xf32> -> vector<8x128xf32>
    %c0_6 = arith.constant 0 : index
    %c0_7 = arith.constant 0 : index
    %6 = vector.load %arg4[%c0_6, %c0_7] : memref<8x128xf32, #tpu.memory_space<vmem>>, vector<8x128xf32>
    tpu.vector_store %arg4[%c0_6, %c0_7], %5 {strides = array<i32>} : memref<8x128xf32, #tpu.memory_space<vmem>>, vector<8x128xf32>,
    return
  }
  func.func @transform_0(%arg0: i32) -> (i32, i32) {
    %c0_i32 = arith.constant 0 : i32
    %c0_i32_0 = arith.constant 0 : i32
    return %arg0, %c0_i32 : i32, i32
  }
  func.func @transform_1(%arg0: i32) -> (i32, i32) {
    %c0_i32 = arith.constant 0 : i32
    %c0_i32_0 = arith.constant 0 : i32
    %c0_i32_1 = arith.constant 0 : i32
    return %c0_i32, %c0_i32_0 : i32, i32
  }
  func.func @transform_2(%arg0: i32) -> (i32, i32) {
    %c0_i32 = arith.constant 0 : i32
    %c0_i32_0 = arith.constant 0 : i32
    %c0_i32_1 = arith.constant 0 : i32
    return %c0_i32, %c0_i32_0 : i32, i32
  }
  func.func @transform_3(%arg0: i32) -> (i32, i32) {
    %c0_i32 = arith.constant 0 : i32
    %c0_i32_0 = arith.constant 0 : i32
    return %arg0, %c0_i32 : i32, i32
  }
}

</mosaic_0001>

<bundles_post_ra>
// kernel: tpu_custom_call.1
= control target key start
LH: loop header
LB: loop body
LE: loop exit
PB: predicated region body
PF: predicated region fallthrough
CT: control target
= control target key end

     0   :  { %8 = vsyncpa [#allocation3], 0  ;;  %s601_s0 = inlined_call_operand.hbm [shape: f32[8,128], index: 0, kind: input, shape index: {}]   ;;  %s602_s1 = inlined_call_operand.hbm [shape: f32[128,128], index: 1, kind: input, shape index: {}]   ;;  %s603_s2 = inlined_call_operand.hbm [shape: f32[128,128], index: 2, kind: input, shape index: {}]   ;;  %s604_s3 = inlined_call_operand.hbm [shape: f32[8,128], index: 3, kind: output, shape index: {}]  }
   0x1   :  { %9 = vsyncpa [#allocation6], 0 }
   0x2   :  { %10 = vsyncpa [#allocation4], 0  ;;  %s502_s12 = smov [#allocation5]   ;;  %s408_s16 = scalar_lea.hbm %s602_s1, 2048 }
   0x3   :  { %s26_s13 = sshll.u32 %s502_s12, 4  ;;  %p409_p0 = scmp.ne.s32.totalorder %s602_s1, %s408_s16  ;;  %s27_s13 = int_to_ptr.vmem [resolvable:$true] %s26_s13 }
   0x4   :  { %p412_p1 = scmp.lt.u32.totalorder %s408_s16, %s602_s1 }
   0x6   :  { %p414_p2 = pnand %p412_p1, %p409_p0 }
   0x8   :  { %417 = shalt.err (!%p414_p2)
}
   0x9   :  { %s418_s21 = scalar_lea.vmem %s27_s13, 2048  ;;  %p423_p4 = scmp.lt.s32.totalorder %s27_s13, %s27_s13 }
   0xa   :  { %p419_p3 = scmp.ne.s32.totalorder %s27_s13, %s418_s21  ;;  %p424_p5 = scmp.lt.s32.totalorder %s418_s21, %s418_s21 }
   0xc   :  { %p425_p6 = por %p424_p5, %p423_p4 }
   0xe   :  { %p426_p7 = pnand %p425_p6, %p419_p3 }
  0x10   :  { %429 = shalt.err (!%p426_p7)
}
  0x11   :  { %s503_s22 = smov 128   ;;  %s504_s23 = smov 8  }
  0x12   :  { %32 = dma.hbm_to_vmem [thread:$0]  %s602_s1, 2048, %s27_s13, [#allocation6], %s503_s22, %s503_s22, %s504_s23  }
  0x13   :  { %s505_s26 = smov [#allocation2]   ;;  %s506_s28 = smov [#allocation7]  }
  0x14   :  { %s17_s27 = sshll.u32 %s505_s26, 4  ;;  %s38_s29 = sshll.u32 %s506_s28, 4  ;;  %s18_s27 = int_to_ptr.vmem [resolvable:$true] %s17_s27  ;;  %s39_s29 = int_to_ptr.vmem [resolvable:$true] %s38_s29 }
  0x15   :  { %s430_s5 = scalar_lea.hbm %s601_s0, 128 }
  0x16   :  { %p431_p8 = scmp.ne.s32.totalorder %s601_s0, %s430_s5  ;;  %p434_p9 = scmp.lt.u32.totalorder %s430_s5, %s601_s0 }
  0x18   :  { %p436_p10 = pnand %p434_p9, %p431_p8 }
  0x1a   :  { %439 = shalt.err (!%p436_p10)
}
  0x1b   :  { %s440_s1 = scalar_lea.vmem %s18_s27, 128  ;;  %p445_p12 = scmp.lt.s32.totalorder %s18_s27, %s18_s27 }
  0x1c   :  { %p441_p11 = scmp.ne.s32.totalorder %s18_s27, %s440_s1  ;;  %p446_p13 = scmp.lt.s32.totalorder %s440_s1, %s440_s1 }
  0x1e   :  { %p447_p0 = por %p446_p13, %p445_p12 }
  0x20   :  { %p448_p1 = pnand %p447_p0, %p441_p11 }
  0x22   :  { %451 = shalt.err (!%p448_p1)
}
  0x23   :  { %20 = dma.hbm_to_vmem [thread:$0]  %s601_s0, 128, %s18_s27, [#allocation3]  }
  0x24   :  { %s452_s14 = scalar_lea.hbm %s603_s2, 2048 }
  0x25   :  { %p453_p2 = scmp.ne.s32.totalorder %s603_s2, %s452_s14  ;;  %p456_p3 = scmp.lt.u32.totalorder %s452_s14, %s603_s2 }
  0x27   :  { %p458_p4 = pnand %p456_p3, %p453_p2 }
  0x29   :  { %461 = shalt.err (!%p458_p4)
}
  0x2a   :  { %s462_s19 = scalar_lea.vmem %s39_s29, 2048  ;;  %p467_p6 = scmp.lt.s32.totalorder %s39_s29, %s39_s29 }
  0x2b   :  { %p463_p5 = scmp.ne.s32.totalorder %s39_s29, %s462_s19  ;;  %p468_p7 = scmp.lt.s32.totalorder %s462_s19, %s462_s19 }
  0x2d   :  { %p469_p8 = por %p468_p7, %p467_p6 }
  0x2f   :  { %p470_p9 = pnand %p469_p8, %p463_p5 }
  0x31   :  { %473 = shalt.err (!%p470_p9)
}
  0x32   :  { %44 = dma.hbm_to_vmem [thread:$0]  %s603_s2, 2048, %s39_s29, [#allocation6], %s503_s22, %s503_s22, %s504_s23  }
  0x33   :  { %496 = dma.done.wait [#allocation3], 128  }
  0x34   :  { %497 = vsyncadd [#allocation3], 4294967168 }
  0x35   :  { %498 = dma.done.wait [#allocation6], 4096  }
  0x36   :  { %499 = vsyncadd [#allocation6], 4294963200  ;;  %v507_v0 = vmov 0.0|0.0   ;;  %vm508_vm0 = vmmov 0   ;;  %v509_v1 = vmov 0.0   ;;  %v55_v2 = vld [vmem:[#allocation5] sm:$0xff] }
  0x37   :  { %349 = vmatprep.subr.bf16.mxu0 %v507_v0  ;;  %311 = vmatprep.mubr.msk.f32.mxu0 %vm508_vm0, %v509_v1  ;;  %v56_v3 = vld [vmem:[#allocation5 + $0x8] sm:$0xff]  ;;  %v57_v4 = vld [vmem:[#allocation5 + $0x10] sm:$0xff]  ;;  %v58_v6 = vld [vmem:[#allocation5 + $0x18] sm:$0xff]  ;;  %s510_s2 = smov [#allocation8]  }
  0x38   :  { %373 = vmatprep.subr.bf16.mxu1 %v507_v0  ;;  %346 = vmatprep.mubr.msk.f32.mxu1 %vm508_vm0, %v509_v1  ;;  %v350_v5 = vpack.c.bf16 %v56_v3, %v55_v2  ;;  %v353_v7 = vpack.c.bf16 %v58_v6, %v57_v4  ;;  %v59_v8 = vld [vmem:[#allocation5 + $0x20] sm:$0xff]  ;;  %v60_v9 = vld [vmem:[#allocation5 + $0x28] sm:$0xff]  ;;  %v144_v12 = vld [vmem:[#allocation7 + $0x10] sm:$0xff]  ;;  %s235_s21 = sshll.u32 %s510_s2, 4  ;;  %s236_s21 = int_to_ptr.vmem [resolvable:$true] %s235_s21 }
  0x39   :  { %v142_v10 = vld [vmem:[#allocation7] sm:$0xff]  ;;  %v143_v11 = vld [vmem:[#allocation7 + $0x8] sm:$0xff]  ;;  %v145_v13 = vld [vmem:[#allocation7 + $0x18] sm:$0xff]  ;;  %v356_v14 = vpack.c.bf16 %v60_v9, %v59_v8  ;;  %s474_s22 = scalar_lea.vmem %s236_s21, 128  ;;  %p479_p11 = scmp.lt.s32.totalorder %s236_s21, %s236_s21 }
  0x3a   :  { %351 = vmatpush3.bf16.msra.mxu0 %v350_v5  ;;  %v374_v15 = vpack.c.bf16 %v143_v11, %v142_v10  ;;  %v61_v16 = vld [vmem:[#allocation5 + $0x30] sm:$0xff]  ;;  %v62_v17 = vld [vmem:[#allocation5 + $0x38] sm:$0xff]  ;;  %v377_v18 = vpack.c.bf16 %v145_v13, %v144_v12  ;;  %v146_v19 = vld [vmem:[#allocation7 + $0x20] sm:$0xff]  ;;  %p475_p10 = scmp.ne.s32.totalorder %s236_s21, %s474_s22  ;;  %p480_p12 = scmp.lt.s32.totalorder %s474_s22, %s474_s22 }
  0x3b   :  { %352 = vmatprep.subr.bf16.mxu0 %v507_v0  ;;  %v147_v20 = vld [vmem:[#allocation7 + $0x28] sm:$0xff]  ;;  %v359_v21 = vpack.c.bf16 %v62_v17, %v61_v16  ;;  %v63_v22 = vld [vmem:[#allocation5 + $0x40] sm:$0xff]  ;;  %v148_v25 = vld [vmem:[#allocation7 + $0x30] sm:$0xff] }
  0x3c   :  { %375 = vmatpush3.bf16.msra.mxu1 %v374_v15  ;;  %v64_v23 = vld [vmem:[#allocation5 + $0x48] sm:$0xff]  ;;  %v380_v24 = vpack.c.bf16 %v147_v20, %v146_v19  ;;  %v149_v26 = vld [vmem:[#allocation7 + $0x38] sm:$0xff]  ;;  %v65_v28 = vld [vmem:[#allocation5 + $0x50] sm:$0xff]  ;;  %p481_p13 = por %p480_p12, %p479_p11 }
  0x3d   :  { %376 = vmatprep.subr.bf16.mxu1 %v507_v0  ;;  %v362_v27 = vpack.c.bf16 %v64_v23, %v63_v22  ;;  %v66_v29 = vld [vmem:[#allocation5 + $0x58] sm:$0xff]  ;;  %v383_v30 = vpack.c.bf16 %v149_v26, %v148_v25  ;;  %v150_v31 = vld [vmem:[#allocation7 + $0x40] sm:$0xff]  ;;  %v151_v32 = vld [vmem:[#allocation7 + $0x48] sm:$0xff] }
  0x3e   :  { %354 = vmatpush3.bf16.msra.mxu0 %v353_v7  ;;  %v365_v33 = vpack.c.bf16 %v66_v29, %v65_v28  ;;  %v67_v34 = vld [vmem:[#allocation5 + $0x60] sm:$0xff]  ;;  %v68_v35 = vld [vmem:[#allocation5 + $0x68] sm:$0xff]  ;;  %v386_v36 = vpack.c.bf16 %v151_v32, %v150_v31  ;;  %v69_v38 = vld [vmem:[#allocation5 + $0x70] sm:$0xff]  ;;  %p482_p0 = pnand %p481_p13, %p475_p10 }
  0x3f   :  { %355 = vmatprep.subr.bf16.mxu0 %v507_v0  ;;  %v368_v37 = vpack.c.bf16 %v68_v35, %v67_v34  ;;  %v70_v39 = vld [vmem:[#allocation5 + $0x78] sm:$0xff]  ;;  %v152_v42 = vld [vmem:[#allocation7 + $0x50] sm:$0xff]  ;;  %v154_v45 = vld [vmem:[#allocation7 + $0x60] sm:$0xff] }
  0x40   :  { %378 = vmatpush3.bf16.msra.mxu1 %v377_v18  ;;  %v371_v40 = vpack.c.bf16 %v70_v39, %v69_v38  ;;  %v54_v41 = vld [vmem:[#allocation2] sm:$0xff]  ;;  %v155_v46 = vld [vmem:[#allocation7 + $0x68] sm:$0xff]  ;;  %v156_v48 = vld [vmem:[#allocation7 + $0x70] sm:$0xff] }
  0x41   :  { %379 = vmatprep.subr.bf16.mxu1 %v507_v0  ;;  %v153_v43 = vld [vmem:[#allocation7 + $0x58] sm:$0xff]  ;;  %v392_v47 = vpack.c.bf16 %v155_v46, %v154_v45 }
  0x42   :  { %357 = vmatpush3.bf16.msra.mxu0 %v356_v14  ;;  %v389_v44 = vpack.c.bf16 %v153_v43, %v152_v42  ;;  %v157_v49 = vld [vmem:[#allocation7 + $0x78] sm:$0xff] }
  0x43   :  { %358 = vmatprep.subr.bf16.mxu0 %v507_v0  ;;  %v395_v50 = vpack.c.bf16 %v157_v49, %v156_v48 }
  0x44   :  { %381 = vmatpush3.bf16.msra.mxu1 %v380_v24 }
  0x45   :  { %382 = vmatprep.subr.bf16.mxu1 %v507_v0 }
  0x46   :  { %360 = vmatpush3.bf16.msra.mxu0 %v359_v21 }
  0x47   :  { %361 = vmatprep.subr.bf16.mxu0 %v507_v0 }
  0x48   :  { %384 = vmatpush3.bf16.msra.mxu1 %v383_v30 }
  0x49   :  { %385 = vmatprep.subr.bf16.mxu1 %v507_v0 }
  0x4a   :  { %363 = vmatpush3.bf16.msra.mxu0 %v362_v27 }
  0x4b   :  { %364 = vmatprep.subr.bf16.mxu0 %v507_v0 }
  0x4c   :  { %387 = vmatpush3.bf16.msra.mxu1 %v386_v36 }
  0x4d   :  { %388 = vmatprep.subr.bf16.mxu1 %v507_v0 }
  0x4e   :  { %366 = vmatpush3.bf16.msra.mxu0 %v365_v33 }
  0x4f   :  { %367 = vmatprep.subr.bf16.mxu0 %v507_v0 }
  0x50   :  { %390 = vmatpush3.bf16.msra.mxu1 %v389_v44 }
  0x51   :  { %391 = vmatprep.subr.bf16.mxu1 %v507_v0 }
  0x52   :  { %369 = vmatpush3.bf16.msra.mxu0 %v368_v37 }
  0x53   :  { %370 = vmatprep.subr.bf16.mxu0 %v507_v0 }
  0x54   :  { %393 = vmatpush3.bf16.msra.mxu1 %v392_v47 }
  0x55   :  { %394 = vmatprep.subr.bf16.mxu1 %v507_v0 }
  0x56   :  { %372 = vmatpush3.bf16.msra.mxu0 %v371_v40 }
  0x58   :  { %396 = vmatpush3.bf16.msra.mxu1 %v395_v50 }
  0x59   :  { %312 = vmatmul.mubr.f32.vlgmr.msra.gmra.mrb[0].mxu0 %v54_v41 }
 0x12c   :  { %v137_v51 = vpop.f32.mrb[0].mxu0 }
 0x12d   :  { %406 = vtanh.f32 %v137_v51  ;;  %v313_v52 = vpop.f32.mrb[1].mxu0 }
 0x137   :  { %v407_v53 = vpop.eup %406 }
 0x138   :  { %347 = vmatmul.mubr.f32.vlgmr.msra.gmra.mrb[0].mxu1 %v407_v53 }
 0x20b   :  { %v224_v54 = vpop.f32.mrb[0].mxu1 }
 0x20c   :  { %228 = vst [vmem:[#allocation8] sm:$0xff] %v224_v54  ;;  %v348_v55 = vpop.f32.mrb[1].mxu1 }
 0x20d   :  { %485 = shalt.err (!%p482_p0)
}
 0x20e   :  { %s486_s25 = scalar_lea.hbm %s604_s3, 128 }
 0x20f   :  { %p487_p1 = scmp.ne.s32.totalorder %s604_s3, %s486_s25  ;;  %p490_p2 = scmp.lt.u32.totalorder %s486_s25, %s604_s3 }
 0x211   :  { %p492_p3 = pnand %p490_p2, %p487_p1 }
 0x213   :  { %495 = shalt.err (!%p492_p3)
}
 0x214   :  { %238 = dma.vmem_to_hbm [thread:$0]  %s236_s21, 128, %s604_s3, [#allocation4]  }
 0x215   :  { %500 = dma.done.wait [#allocation4], 128  }
 0x216   :  { %501 = vsyncadd [#allocation4], 4294967168 }
 0x217   :  { %242 = vsyncpa [#allocation3], 1 }
 0x218   :  { %243 = vsyncpa [#allocation6], 1 }
 0x219   :  { %244 = vsyncpa [#allocation4], 1 }

</bundles_post_ra>
